<compile_context>
chip_gen: v6e
topology: v6e:2x2x1
jax: 0.10.0
libtpu: 0.0.40
codegen_flags: <defaults>
</compile_context>

<pallas_src>
import functools

import jax
import jax.numpy as jnp
from jax import lax
from jax.experimental import pallas as pl
from jax.experimental.pallas import tpu as pltpu


def classify_kernel(emb_ref, w_ref, b_ref, labels_ref,
                    logits_ref, nll_ref, acc_ref, *, inv_s):
    """Grid = (batch_tiles ['parallel'], seq_tiles ['arbitrary'])."""
    s = pl.program_id(1)

    # ---- zero the pooled-sum accumulator at the start of the seq reduction ----
    @pl.when(s == 0)
    def _():
        acc_ref[...] = jnp.zeros_like(acc_ref)

    # ---- tile-wise f32 sum over the sequence axis (padded seq rows are zeros) ----
    acc_ref[...] += jnp.sum(emb_ref[...].astype(jnp.float32), axis=1)

    # ---- finalize on the last seq step: scale, classify, log_softmax, NLL ----
    @pl.when(s == pl.num_programs(1) - 1)
    def _():
        pooled = acc_ref[...] * inv_s                                    # [TB, D]
        raw = jnp.dot(pooled, w_ref[...],
                      preferred_element_type=jnp.float32) + b_ref[...]   # [TB, Lp]
        m = jnp.max(raw, axis=-1, keepdims=True)
        z = raw - m
        lse = jnp.log(jnp.sum(jnp.exp(z), axis=-1, keepdims=True))
        log_probs = z - lse                                              # [TB, Lp]
        logits_ref[...] = log_probs

        # CrossEntropyLoss(log_probs, labels): its internal log_softmax is an exact
        # identity on log-probs, so go straight to the NLL pick.
        tb, lp = log_probs.shape
        col = lax.broadcasted_iota(jnp.int32, (tb, lp), 1)
        picked = jnp.sum(jnp.where(col == labels_ref[...], log_probs, 0.0),
                         axis=-1, keepdims=True)                         # [TB, 1]
        # Lane-dense store; padded batch rows have label -1 -> contribute exactly 0.
        nll_ref[...] = jnp.broadcast_to(picked, nll_ref.shape)


def classify_forward(embedded, w, b, labels):
    """embedded: [B,S,D], w: [D,L] (transposed nn.Linear weight), b: [L], labels: [B] int."""
    B, S, D = embedded.shape
    L = w.shape[1]
    itemsize = jnp.dtype(embedded.dtype).itemsize

    # ---- tile sizes (keep double-buffered embedded tiles well under v7x's 64 MiB VMEM) ----
    TB = min(B, 256)
    TS = min(S, 512)
    while TB * TS * D * itemsize * 4 > (24 << 20) and TS > 8:
        TS = max(8, TS // 2)

    B_pad = -(-B // TB) * TB
    S_pad = -(-S // TS) * TS
    L_pad = -(-L // 128) * 128
    num_bt = B_pad // TB
    num_st = S_pad // TS

    # ---- padding: aligned tiles + lane-dense outputs ----
    emb_p = embedded
    if (B_pad, S_pad) != (B, S):
        emb_p = jnp.pad(embedded, ((0, B_pad - B), (0, S_pad - S), (0, 0)))
    w_p = jnp.pad(w.astype(jnp.float32), ((0, 0), (0, L_pad - L)))
    # -1e30 bias on padded label columns keeps them out of the softmax.
    b_p = jnp.pad(b.astype(jnp.float32), (0, L_pad - L),
                  constant_values=-1e30).reshape(1, L_pad)
    labels_p = jnp.full((B_pad, 1), -1, dtype=jnp.int32)
    labels_p = labels_p.at[:B, 0].set(labels.astype(jnp.int32))

    # ---- VMEM budget / scheduler cost hints ----
    emb_tile_bytes = TB * TS * D * itemsize
    resident_bytes = 4 * (D * L_pad + L_pad + TB * L_pad + TB * 128 + TB * D + TB)
    vmem_limit = int(min(max(4 * emb_tile_bytes + 4 * resident_bytes + (4 << 20),
                             32 << 20), 48 << 20))
    cost = pl.CostEstimate(
        flops=2 * B_pad * S_pad * D + 2 * B_pad * D * L_pad + 8 * B_pad * L_pad,
        transcendentals=B_pad * L_pad + B_pad,
        bytes_accessed=(B_pad * S_pad * D * itemsize + D * L_pad * 4
                        + B_pad * L_pad * 4 + B_pad * 128 * 4),
    )

    logits_pad, nll = pl.pallas_call(
        functools.partial(classify_kernel, inv_s=1.0 / S),
        out_shape=(
            jax.ShapeDtypeStruct((B_pad, L_pad), jnp.float32),  # log-softmax logits (padded)
            jax.ShapeDtypeStruct((B_pad, 128), jnp.float32),    # per-example picked log-prob
        ),
        grid_spec=pltpu.PrefetchScalarGridSpec(
            num_scalar_prefetch=0,
            grid=(num_bt, num_st),
            in_specs=[
                pl.BlockSpec((TB, TS, D), lambda i, s: (i, s, 0)),   # embedded tiles
                pl.BlockSpec((D, L_pad), lambda i, s: (0, 0)),       # W (resident)
                pl.BlockSpec((1, L_pad), lambda i, s: (0, 0)),       # bias (resident)
                pl.BlockSpec((TB, 1), lambda i, s: (i, 0)),          # labels
            ],
            out_specs=(
                pl.BlockSpec((TB, L_pad), lambda i, s: (i, 0)),
                pl.BlockSpec((TB, 128), lambda i, s: (i, 0)),
            ),
            scratch_shapes=[pltpu.VMEM((TB, D), jnp.float32)],       # pooled-sum accumulator
        ),
        compiler_params=pltpu.CompilerParams(
            dimension_semantics=("parallel", "arbitrary"),
            vmem_limit_bytes=vmem_limit,
        ),
        cost_estimate=cost,
    )(emb_p, w_p, b_p, labels_p)

    logits = logits_pad[:B, :L]
    loss = -jnp.sum(nll[:B, 0]) / B
    return {"logits": logits, "loss": loss}


if __name__ == "__main__":
    # Small shapes consistent with the module: batch=2, seq=8, intermediate_dims=32, num_labels=4.
    B, S, D, L = 2, 8, 32, 4
    key = jax.random.PRNGKey(0)
    k_emb, k_w, k_b, k_lbl = jax.random.split(key, 4)

    embedded = jax.random.normal(k_emb, (B, S, D), dtype=jnp.float32)
    # nn.Linear(intermediate_dims, num_labels): weight [L, D], bias [L]; stored transposed [D, L].
    w = (jax.random.normal(k_w, (L, D), dtype=jnp.float32) * (1.0 / jnp.sqrt(D))).T
    bias = jax.random.normal(k_b, (L,), dtype=jnp.float32) * 0.01
    labels = jax.random.randint(k_lbl, (B,), 0, L, dtype=jnp.int32)

    out = classify_forward(embedded, w, bias, labels)
    jax.block_until_ready(out)

    # Pure-JAX reference (matches PyTorch: log_softmax output, CE re-applies log_softmax).
    pooled_ref = jnp.mean(embedded, axis=1)
    logits_ref = jax.nn.log_softmax(pooled_ref @ w + bias, axis=-1)
    logp2_ref = jax.nn.log_softmax(logits_ref, axis=-1)
    loss_ref = -jnp.mean(logp2_ref[jnp.arange(B), labels])
    assert jnp.allclose(out["logits"], logits_ref, atol=1e-5), "logits mismatch"
    assert jnp.allclose(out["loss"], loss_ref, atol=1e-5), "loss mismatch"

    print("KERNEL_OK")
</pallas_src>

<mosaic_0001>
module attributes {stable_mosaic.version = 11 : i64} {
  func.func @classify_kernel(%arg0: i32, %arg1: i32, %arg2: memref<2x8x32xf32, #tpu.memory_space<vmem>>, %arg3: memref<32x128xf32, #tpu.memory_space<vmem>>, %arg4: memref<1x128xf32, #tpu.memory_space<vmem>>, %arg5: memref<2x1xi32, #tpu.memory_space<vmem>>, %arg6: memref<2x128xf32, #tpu.memory_space<vmem>>, %arg7: memref<2x128xf32, #tpu.memory_space<vmem>>, %arg8: memref<2x32xf32, #tpu.memory_space<vmem>>) attributes {dimension_semantics = [#tpu.dimension_semantics<parallel>, #tpu.dimension_semantics<arbitrary>], iteration_bounds = array<i64: 1, 1>, scalar_prefetch = 0 : i64, scratch_operands = 1 : i64, tpu.core_type = #tpu.core_type<tc>, window_params = [{transform_indices = @transform_0, window_bounds = array<i64: 2, 8, 32>}, {pipeline_mode = #tpu.pipeline_mode<synchronous>, transform_indices = @transform_1, window_bounds = array<i64: 32, 128>}, {pipeline_mode = #tpu.pipeline_mode<synchronous>, transform_indices = @transform_2, window_bounds = array<i64: 1, 128>}, {transform_indices = @transform_3, window_bounds = array<i64: 2, 1>}, {transform_indices = @transform_4, window_bounds = array<i64: 2, 128>}, {transform_indices = @transform_5, window_bounds = array<i64: 2, 128>}]} {
    %c0_i32 = arith.constant 0 : i32
    %0 = arith.cmpi eq, %arg1, %c0_i32 : i32
    %1 = arith.extui %0 : i1 to i32
    %c0_i32_0 = arith.constant 0 : i32
    %2 = arith.cmpi ne, %1, %c0_i32_0 : i32
    scf.if %2 {
      %cst_9 = arith.constant 0.000000e+00 : f32
      %11 = vector.broadcast %cst_9 : f32 to vector<2x32xf32>
      %c0_10 = arith.constant 0 : index
      %c0_11 = arith.constant 0 : index
      %12 = vector.load %arg8[%c0_10, %c0_11] : memref<2x32xf32, #tpu.memory_space<vmem>>, vector<2x32xf32>
      tpu.vector_store %arg8[%c0_10, %c0_11], %11 {strides = array<i32>} : memref<2x32xf32, #tpu.memory_space<vmem>>, vector<2x32xf32>,
    } else {
    }
    %c0 = arith.constant 0 : index
    %c0_1 = arith.constant 0 : index
    %3 = vector.load %arg8[%c0, %c0_1] : memref<2x32xf32, #tpu.memory_space<vmem>>, vector<2x32xf32>
    %c0_2 = arith.constant 0 : index
    %c0_3 = arith.constant 0 : index
    %c0_4 = arith.constant 0 : index
    %4 = vector.load %arg2[%c0_2, %c0_3, %c0_4] : memref<2x8x32xf32, #tpu.memory_space<vmem>>, vector<2x8x32xf32>
    %cst = arith.constant dense<0.000000e+00> : vector<2x32xf32>
    %5 = vector.multi_reduction <add>, %4, %cst [1] : vector<2x8x32xf32> to vector<2x32xf32>
    %6 = arith.addf %3, %5 : vector<2x32xf32>
    %c0_5 = arith.constant 0 : index
    %c0_6 = arith.constant 0 : index
    %7 = vector.load %arg8[%c0_5, %c0_6] : memref<2x32xf32, #tpu.memory_space<vmem>>, vector<2x32xf32>
    tpu.vector_store %arg8[%c0_5, %c0_6], %6 {strides = array<i32>} : memref<2x32xf32, #tpu.memory_space<vmem>>, vector<2x32xf32>,
    %c0_i32_7 = arith.constant 0 : i32
    %8 = arith.cmpi eq, %arg1, %c0_i32_7 : i32
    %9 = arith.extui %8 : i1 to i32
    %c0_i32_8 = arith.constant 0 : i32
    %10 = arith.cmpi ne, %9, %c0_i32_8 : i32
    scf.if %10 {
      %c0_9 = arith.constant 0 : index
      %c0_10 = arith.constant 0 : index
      %11 = vector.load %arg8[%c0_9, %c0_10] : memref<2x32xf32, #tpu.memory_space<vmem>>, vector<2x32xf32>
      %cst_11 = arith.constant 1.250000e-01 : f32
      %12 = vector.broadcast %cst_11 : f32 to vector<2x32xf32>
      %13 = arith.mulf %11, %12 : vector<2x32xf32>
      %c0_12 = arith.constant 0 : index
      %c0_13 = arith.constant 0 : index
      %14 = vector.load %arg3[%c0_12, %c0_13] : memref<32x128xf32, #tpu.memory_space<vmem>>, vector<32x128xf32>
      %cst_14 = arith.constant dense<0.000000e+00> : vector<2x128xf32>
      %15 = tpu.matmul %13, %14, %cst_14 {dimension_numbers = #tpu.dot_dimension_numbers<[1], [0], [0], [1], [0, 0, 1, 1], [], []>} : vector<2x32xf32>, vector<32x128xf32>, vector<2x128xf32> -> vector<2x128xf32>
      %c0_15 = arith.constant 0 : index
      %c0_16 = arith.constant 0 : index
      %16 = vector.load %arg4[%c0_15, %c0_16] : memref<1x128xf32, #tpu.memory_space<vmem>>, vector<1x128xf32>
      %17 = vector.broadcast %16 : vector<1x128xf32> to vector<2x128xf32>
      %18 = arith.addf %15, %17 : vector<2x128xf32>
      %cst_17 = arith.constant dense<0xFF800000> : vector<2xf32>
      %19 = vector.multi_reduction <maximumf>, %18, %cst_17 [1] : vector<2x128xf32> to vector<2xf32>
      %20 = vector.shape_cast %19 : vector<2xf32> to vector<2x1xf32>
      %21 = vector.broadcast %20 : vector<2x1xf32> to vector<2x128xf32>
      %22 = arith.subf %18, %21 : vector<2x128xf32>
      %23 = math.exp %22 : vector<2x128xf32>
      %cst_18 = arith.constant dense<0.000000e+00> : vector<2xf32>
      %24 = vector.multi_reduction <add>, %23, %cst_18 [1] : vector<2x128xf32> to vector<2xf32>
      %25 = vector.shape_cast %24 : vector<2xf32> to vector<2x1xf32>
      %26 = math.log %25 : vector<2x1xf32>
      %27 = vector.broadcast %26 : vector<2x1xf32> to vector<2x128xf32>
      %28 = arith.subf %22, %27 : vector<2x128xf32>
      %c0_19 = arith.constant 0 : index
      %c0_20 = arith.constant 0 : index
      %29 = vector.load %arg6[%c0_19, %c0_20] : memref<2x128xf32, #tpu.memory_space<vmem>>, vector<2x128xf32>
      tpu.vector_store %arg6[%c0_19, %c0_20], %28 {strides = array<i32>} : memref<2x128xf32, #tpu.memory_space<vmem>>, vector<2x128xf32>,
      %30 = tpu.iota {dimensions = array<i32: 1>} : vector<2x128xi32>
      %c0_21 = arith.constant 0 : index
      %c0_22 = arith.constant 0 : index
      %31 = vector.load %arg5[%c0_21, %c0_22] : memref<2x1xi32, #tpu.memory_space<vmem>>, vector<2x1xi32>
      %32 = vector.broadcast %31 : vector<2x1xi32> to vector<2x128xi32>
      %33 = arith.cmpi eq, %30, %32 : vector<2x128xi32>
      %cst_23 = arith.constant 0.000000e+00 : f32
      %34 = vector.broadcast %cst_23 : f32 to vector<2x128xf32>
      %35 = arith.select %33, %28, %34 : vector<2x128xi1>, vector<2x128xf32>
      %cst_24 = arith.constant dense<0.000000e+00> : vector<2xf32>
      %36 = vector.multi_reduction <add>, %35, %cst_24 [1] : vector<2x128xf32> to vector<2xf32>
      %37 = vector.shape_cast %36 : vector<2xf32> to vector<2x1xf32>
      %38 = vector.shape_cast %37 : vector<2x1xf32> to vector<2x1xf32>
      %39 = vector.broadcast %38 : vector<2x1xf32> to vector<2x128xf32>
      %c0_25 = arith.constant 0 : index
      %c0_26 = arith.constant 0 : index
      %40 = vector.load %arg7[%c0_25, %c0_26] : memref<2x128xf32, #tpu.memory_space<vmem>>, vector<2x128xf32>
      tpu.vector_store %arg7[%c0_25, %c0_26], %39 {strides = array<i32>} : memref<2x128xf32, #tpu.memory_space<vmem>>, vector<2x128xf32>,
    } else {
    }
    return
  }
  func.func @transform_0(%arg0: i32, %arg1: i32) -> (i32, i32, i32) {
    %c0_i32 = arith.constant 0 : i32
    %c0_i32_0 = arith.constant 0 : i32
    return %arg0, %arg1, %c0_i32 : i32, i32, i32
  }
  func.func @transform_1(%arg0: i32, %arg1: i32) -> (i32, i32) {
    %c0_i32 = arith.constant 0 : i32
    %c0_i32_0 = arith.constant 0 : i32
    %c0_i32_1 = arith.constant 0 : i32
    return %c0_i32, %c0_i32_0 : i32, i32
  }
  func.func @transform_2(%arg0: i32, %arg1: i32) -> (i32, i32) {
    %c0_i32 = arith.constant 0 : i32
    %c0_i32_0 = arith.constant 0 : i32
    %c0_i32_1 = arith.constant 0 : i32
    return %c0_i32, %c0_i32_0 : i32, i32
  }
  func.func @transform_3(%arg0: i32, %arg1: i32) -> (i32, i32) {
    %c0_i32 = arith.constant 0 : i32
    %c0_i32_0 = arith.constant 0 : i32
    return %arg0, %c0_i32 : i32, i32
  }
  func.func @transform_4(%arg0: i32, %arg1: i32) -> (i32, i32) {
    %c0_i32 = arith.constant 0 : i32
    %c0_i32_0 = arith.constant 0 : i32
    return %arg0, %c0_i32 : i32, i32
  }
  func.func @transform_5(%arg0: i32, %arg1: i32) -> (i32, i32) {
    %c0_i32 = arith.constant 0 : i32
    %c0_i32_0 = arith.constant 0 : i32
    return %arg0, %c0_i32 : i32, i32
  }
}

</mosaic_0001>

<bundles_post_ra>
// kernel: tpu_custom_call.1
= control target key start
LH: loop header
LB: loop body
LE: loop exit
PB: predicated region body
PF: predicated region fallthrough
CT: control target
= control target key end

     0   :  { %11 = vsyncpa [#allocation4], 0  ;;  %s412_s0 = inlined_call_operand.hbm [shape: f32[2,8,32], index: 0, kind: input, shape index: {}]   ;;  %s413_s1 = inlined_call_operand.hbm [shape: f32[32,128], index: 1, kind: input, shape index: {}]   ;;  %s414_s2 = inlined_call_operand.vmem [shape: f32[1,128], index: 2, kind: input, shape index: {}]   ;;  %s415_s3 = inlined_call_operand.vmem [shape: s32[2,1], index: 3, kind: input, shape index: {}]   ;;  %s416_s4 = inlined_call_operand.hbm [shape: f32[2,128], index: 4, kind: output, shape index: {0}]   ;;  %s417_s5 = inlined_call_operand.hbm [shape: f32[2,128], index: 5, kind: output, shape index: {1}]  }
   0x1   :  { %12 = vsyncpa [#allocation7], 0 }
   0x2   :  { %13 = vsyncpa [#allocation5], 0 }
   0x3   :  { %14 = vsyncpa [#allocation10], 0  ;;  %s347_s18 = smov [#allocation3]  }
   0x4   :  { %s20_s19 = sshll.u32 %s347_s18, 4  ;;  %s21_s19 = int_to_ptr.vmem [resolvable:$true] %s20_s19 }
   0x5   :  { %s267_s20 = scalar_lea.vmem %s21_s19, 256  ;;  %p272_p1 = scmp.lt.s32.totalorder %s21_s19, %s21_s19 }
   0x6   :  { %p268_p0 = scmp.ne.s32.totalorder %s21_s19, %s267_s20  ;;  %p273_p2 = scmp.lt.s32.totalorder %s267_s20, %s267_s20 }
   0x8   :  { %p274_p3 = por %p273_p2, %p272_p1 }
   0xa   :  { %p275_p4 = pnand %p274_p3, %p268_p0 }
   0xc   :  { %278 = shalt.err (!%p275_p4)
}
   0xd   :  { %s348_s21 = smov 128   ;;  %s349_s22 = smov 8  }
   0xe   :  { %26 = dma.hbm_to_vmem [thread:$0]  %s412_s0, 256, %s21_s19, [#allocation4], %s348_s21, %s348_s21, %s349_s22  }
   0xf   :  { %s350_s25 = smov [#allocation6]  }
  0x10   :  { %s32_s26 = sshll.u32 %s350_s25, 4  ;;  %s33_s26 = int_to_ptr.vmem [resolvable:$true] %s32_s26 }
  0x11   :  { %s287_s27 = scalar_lea.vmem %s33_s26, 512  ;;  %p292_p6 = scmp.lt.s32.totalorder %s33_s26, %s33_s26 }
  0x12   :  { %p288_p5 = scmp.ne.s32.totalorder %s33_s26, %s287_s27  ;;  %p293_p7 = scmp.lt.s32.totalorder %s287_s27, %s287_s27 }
  0x14   :  { %p294_p8 = por %p293_p7, %p292_p6 }
  0x16   :  { %p295_p9 = pnand %p294_p8, %p288_p5 }
  0x18   :  { %298 = shalt.err (!%p295_p9)
}
  0x19   :  { %38 = dma.hbm_to_vmem [thread:$0]  %s413_s1, 512, %s33_s26, [#allocation7], %s348_s21, %s348_s21, %s349_s22  }
  0x1a   :  { %339 = dma.done.wait [#allocation4], 256  }
  0x1b   :  { %340 = vsyncadd [#allocation4], 4294967040 }
  0x1c   :  { %341 = dma.done.wait [#allocation7], 512  }
  0x1d   :  { %342 = vsyncadd [#allocation7], 4294966784  ;;  %vm53_vm0 = vcmask 254976   ;;  %v351_v0 = vmov 0.0   ;;  %vm352_vm1 = vmmov 0   ;;  %vm58_vm2 = vcmask 261120  }
  0x1e   :  { %54 = vst.msk [vmem:[#allocation2] sm:$0x3] %vm53_vm0, %v351_v0  ;;  %233 = vmatprep.subr.mxu0 %v351_v0  ;;  %241 = vmatprep.mubr.msk.f32.mxu0 %vm352_vm1, %v351_v0  ;;  %v89_v1 = vld [vmem:[#allocation6 + $0x18] sm:$0xff]  ;;  %v88_v2 = vld [vmem:[#allocation6 + $0x10] sm:$0xff]  ;;  %v87_v4 = vld [vmem:[#allocation6 + $0x8] sm:$0xff]  ;;  %vm75_vm3 = vcmask 1041409   ;;  %v184_v39 = vlaneseq }
  0x1f   :  { %234 = vmatpush3.msra.mxu0 %v89_v1  ;;  %v56_v3 = vld [vmem:[#allocation3] sm:$0xff]  ;;  %v57_v5 = vld [vmem:[#allocation3 + $0x8] sm:$0xff]  ;;  %v86_v9 = vld [vmem:[#allocation6] sm:$0xff]  ;;  %vm170_vm4 = vcmask 1041408   ;;  %v353_v32 = vmov 0  }
  0x20   :  { %235 = vmatprep.subr.mxu0 %v351_v0  ;;  %v59_v6 = vsel %vm58_vm2, %v56_v3, 0.0  ;;  %v66_v8 = vsel %vm58_vm2, %v57_v5, 0.0  ;;  %v226_v26 = vld [vmem:[%s414_s2] ss:$0 sm:$0xff]  ;;  %253 = vset.pattern.permute.xlu1 %v353_v32  ;;  %v185_v40 = vand.u32 127, %v184_v39  ;;  %s354_s2 = smov [#allocation8]  }
  0x21   :  { %236 = vmatpush3.msra.mxu0 %v88_v2  ;;  %v60_v7 = vrot.slane %v59_v6, 4  ;;  %v67_v10 = vrot.slane %v66_v8, 4  ;;  %v186_v31 = vld [vmem:[%s415_s3] sm:$0x3]  ;;  %254 = vset.pattern.permute.xlu0 %v353_v32  ;;  %s202_s3 = sshll.u32 %s354_s2, 4  ;;  %s203_s3 = int_to_ptr.vmem [resolvable:$true] %s202_s3 }
  0x22   :  { %237 = vmatprep.subr.mxu0 %v351_v0  ;;  %188 = vperm.xlu1 %253, %v186_v31   ;;  %s299_s7 = scalar_lea.vmem %s203_s3, 32  ;;  %p304_p11 = scmp.lt.s32.totalorder %s203_s3, %s203_s3 }
  0x23   :  { %238 = vmatpush3.msra.mxu0 %v87_v4  ;;  %v61_v11 = vadd.f32 %v60_v7, %v59_v6  ;;  %v68_v12 = vadd.f32 %v67_v10, %v66_v8  ;;  %p300_p10 = scmp.ne.s32.totalorder %s203_s3, %s299_s7  ;;  %p305_p12 = scmp.lt.s32.totalorder %s299_s7, %s299_s7 }
  0x24   :  { %239 = vmatprep.subr.mxu0 %v351_v0 }
  0x25   :  { %240 = vmatpush3.msra.mxu0 %v86_v9  ;;  %v62_v13 = vrot.slane %v61_v11, 2  ;;  %v69_v14 = vrot.slane %v68_v12, 2  ;;  %v55_v20 = vld [vmem:[#allocation2] sm:$0x3]  ;;  %p306_p13 = por %p305_p12, %p304_p11 }
  0x27   :  { %v63_v15 = vadd.f32 %v62_v13, %v61_v11  ;;  %v70_v16 = vadd.f32 %v69_v14, %v68_v12  ;;  %p307_p0 = pnand %p306_p13, %p300_p10 }
  0x29   :  { %v64_v17 = vrot.slane %v63_v15, 1  ;;  %v71_v18 = vrot.slane %v70_v16, 1 }
  0x2b   :  { %v65_v19 = vadd.f32 %v64_v17, %v63_v15  ;;  %v72_v21 = vadd.f32 %v71_v18, %v70_v16 }
  0x2d   :  { %v76_v22 = vsel %vm75_vm3, %v72_v21, %v65_v19 }
  0x2e   :  { %v78_v23 = vadd.f32 %v76_v22, %v55_v20 }
  0x30   :  { %80 = vst.msk [vmem:[#allocation2] sm:$0x3] %vm53_vm0, %v78_v23 }
  0x37   :  { %v84_v24 = vld [vmem:[#allocation2] sm:$0x3] }
  0x38   :  { %v85_v25 = vmul.f32 0.125, %v84_v24 }
  0x3a   :  { %242 = vmatmul.mubr.msk.f32.vlgmr.msra.gmra.mxu0 %vm58_vm2, %v85_v25 }
  0x9d   :  { %v189_v41 = vpop.permute.xlu1 %188 }
  0x9e   :  { %vm190_vm5 = vcmp.eq.s32.totalorder %v185_v40, %v189_v41 }
  0xfa   :  { %v166_v27 = vpop.f32.mrf.mxu0 }
  0xfb   :  { %v167_v28 = vadd.f32 %v226_v26, %v166_v27 }
  0xfc   :  { %v243_v29 = vpop.f32.mrf.mxu0 }
  0xfd   :  { %v171_v30 = vsel %vm170_vm4, %v167_v28, -inf }
  0xfe   :  { %172 = vmax.xlane.f32.xlu0 %v171_v30 }
 0x187   :  { %v173_v33 = vpop.xlane.xlu0 %172 }
 0x188   :  { %v174_v34 = vsub.f32 %v167_v28, %v173_v33 }
 0x18a   :  { %v175_v35 = vmul.f32 1.442695, %v174_v34 }
 0x18c   :  { %255 = vpow2.f32 %v175_v35 }
 0x199   :  { %v256_v36 = vpop.eup %255 }
 0x19a   :  { %v177_v37 = vsel %vm170_vm4, %v256_v36, 0.0 }
 0x19b   :  { %178 = vadd.xlane.f32.xlu0 %v177_v37 }
 0x224   :  { %v179_v38 = vpop.xlane.xlu0 %178 }
 0x225   :  { %257 = vlog2.f32 %v179_v38 }
 0x232   :  { %v258_v42 = vpop.eup %257 }
 0x233   :  { %v181_v43 = vmul.f32 0.6931472, %v258_v42 }
 0x235   :  { %v182_v44 = vsub.f32 %v174_v34, %v181_v43 }
 0x237   :  { %v191_v45 = vsel %vm190_vm5, %v182_v44, 0.0  ;;  %183 = vst [vmem:[#allocation8] sm:$0x3] %v182_v44 }
 0x238   :  { %v192_v46 = vsel %vm170_vm4, %v191_v45, 0.0 }
 0x239   :  { %193 = vadd.xlane.f32.xlu1 %v192_v46 }
 0x23a   :  { %310 = shalt.err (!%p307_p0)
}
 0x23b   :  { %205 = dma.vmem_to_hbm [thread:$0]  %s203_s3, 32, %s416_s4, [#allocation5]  }
 0x23c   :  { %s355_s10 = smov [#allocation9]  }
 0x23d   :  { %s212_s11 = sshll.u32 %s355_s10, 4  ;;  %s213_s11 = int_to_ptr.vmem [resolvable:$true] %s212_s11 }
 0x23e   :  { %s319_s12 = scalar_lea.vmem %s213_s11, 32  ;;  %p324_p2 = scmp.lt.s32.totalorder %s213_s11, %s213_s11 }
 0x23f   :  { %p320_p1 = scmp.ne.s32.totalorder %s213_s11, %s319_s12  ;;  %p325_p3 = scmp.lt.s32.totalorder %s319_s12, %s319_s12 }
 0x241   :  { %p326_p4 = por %p325_p3, %p324_p2 }
 0x243   :  { %p327_p5 = pnand %p326_p4, %p320_p1 }
 0x2c2   :  { %v194_v47 = vpop.xlane.xlu1 %193 }
 0x2c3   :  { %195 = vst [vmem:[#allocation9] sm:$0x3] %v194_v47 }
 0x2c4   :  { %330 = shalt.err (!%p327_p5)
}
 0x2c5   :  { %215 = dma.vmem_to_hbm [thread:$0]  %s213_s11, 32, %s417_s5, [#allocation10]  }
 0x2c6   :  { %343 = dma.done.wait [#allocation5], 32  }
 0x2c7   :  { %344 = vsyncadd [#allocation5], 4294967264 }
 0x2c8   :  { %345 = dma.done.wait [#allocation10], 32  }
 0x2c9   :  { %346 = vsyncadd [#allocation10], 4294967264 }
 0x2ca   :  { %222 = vsyncpa [#allocation4], 1 }
 0x2cb   :  { %223 = vsyncpa [#allocation7], 1 }
 0x2cc   :  { %224 = vsyncpa [#allocation5], 1 }
 0x2cd   :  { %225 = vsyncpa [#allocation10], 1 }

</bundles_post_ra>
